<compile_context>
chip_gen: v5e
topology: v5e:2x2
jax: 0.10.0
libtpu: 0.0.40
codegen_flags: <defaults>
</compile_context>

<pallas_src>
import functools

import numpy as np
import jax
import jax.numpy as jnp
from jax.experimental import pallas as pl
from jax.experimental.pallas import tpu as pltpu

_MIB = 1024 * 1024


def _round_up(x: int, m: int) -> int:
    return ((x + m - 1) // m) * m


def _tpu_budget():
    """Generation-aware (max column tile, VMEM budget bytes, #TensorCores)."""
    vmem_bytes = 64 * _MIB          # conservative default (v7x-sized)
    n_cores = 1
    try:
        info = pltpu.get_tpu_info()
        vmem_bytes = int(getattr(info, "vmem_capacity_bytes", 0) or vmem_bytes)
        n_cores = int(getattr(info, "num_cores", 0)
                      or getattr(info, "tensorcores_per_chip", 0) or 1)
    except Exception:               # non-TPU backend / older jax: keep defaults
        pass
    if vmem_bytes >= 96 * _MIB:     # v5e / v6e: 128 MiB physical VMEM
        return 512, min(100 * _MIB, vmem_bytes - 16 * _MIB), n_cores
    # v7x: 64 MiB physical VMEM per TensorCore
    return 256, max(32 * _MIB, min(48 * _MIB, (vmem_bytes * 3) // 4)), n_cores


@functools.lru_cache(maxsize=64)
def _dft_constants(B, S, H, Sp, Hk, Nh, Hh):
    """Zero-embedded per-axis DFT matrices.  HOST numpy only (converted to
    device arrays per call, so nothing device-resident is cached)."""
    h = np.arange(H)
    k3 = np.arange(Hh)
    ang_h = 2.0 * np.pi * np.outer(h, k3) / H
    ch = np.zeros((Hk, Nh), np.float32)
    ch[:H, :Hh] = np.cos(ang_h)
    shn = np.zeros((Hk, Nh), np.float32)
    shn[:H, :Hh] = -np.sin(ang_h)            # sign folded: i1 = x @ (-sin)

    s = np.arange(S)
    ang_s = 2.0 * np.pi * np.outer(s, s) / S
    cs = np.zeros((Sp, Sp), np.float32)
    cs[:S, :S] = np.cos(ang_s)
    ss = np.zeros((Sp, Sp), np.float32)
    ss[:S, :S] = np.sin(ang_s)

    b = np.arange(B)
    ang_b = 2.0 * np.pi * np.outer(b, b) / B
    cb = np.cos(ang_b).astype(np.float32)
    sb = np.sin(ang_b).astype(np.float32)

    for m in (ch, shn, cs, ss, cb, sb):
        m[np.abs(m) < 1e-12] = 0.0
    return ch, shn, cs, ss, cb, sb


def _make_kernel(B, Sp, op_dtype):
    """Kernel factory; B, Sp and the stage-2 operand dtype are static."""

    def kernel(x_ref, ch_ref, shn_ref, cs_ref, ss_ref, cb_ref, sb_ref, o_ref):
        b = pl.program_id(1)

        # The batch grid axis is the stage-3 reduction: the output block has a
        # constant index map along it and acts as the VMEM accumulator.
        @pl.when(b == 0)
        def _init():
            o_ref[...] = jnp.zeros_like(o_ref)

        # ---- Stage 1: hidden-axis DFT for this batch row / column tile.
        x = x_ref[...]
        r1 = jnp.dot(x, ch_ref[...], preferred_element_type=jnp.float32)
        i1 = jnp.dot(x, shn_ref[...], preferred_element_type=jnp.float32)

        # ---- Stage 2: seq-axis DFT.  MXU operands in op_dtype, f32 accumulation.
        # NOTE: with bf16 operands r1/i1 are re-quantized once here; pass
        # weight_dtype=jnp.float32 for the exact-math path.
        r1o = r1.astype(op_dtype)
        i1o = i1.astype(op_dtype)
        cs = cs_ref[...]
        ss = ss_ref[...]
        r2 = (jnp.dot(cs, r1o, preferred_element_type=jnp.float32)
              + jnp.dot(ss, i1o, preferred_element_type=jnp.float32))
        i2 = (jnp.dot(cs, i1o, preferred_element_type=jnp.float32)
              - jnp.dot(ss, r1o, preferred_element_type=jnp.float32))

        # ---- Stage 3 (fused): scatter this input batch's contribution into
        # every output batch row of the resident output block.  Only r2/i2 and
        # the accumulator are live — no per-batch slab lists, no vreg spills.
        # TODO(synk): for very large B, do the (B,B) mix as a wrapper einsum /
        # MXU contraction instead of O(B^2) VPU slab MACs.
        for c in range(B):
            coef_r = cb_ref[c, b]          # f32 scalars from SMEM
            coef_i = sb_ref[c, b]
            o_ref[c * Sp:(c + 1) * Sp, :] += coef_r * r2 + coef_i * i2

    return kernel


def fourier_transform_layer(x: jax.Array, *,
                            weight_dtype=jnp.bfloat16) -> jax.Array:
    """real(fftn(x)) for a 3-D (batch, seq, hidden) input (FNet mixing layer)."""
    if x.ndim != 3:
        raise ValueError("fourier_transform_layer expects (batch, seq, hidden)")
    B, S, H = map(int, x.shape)

    Sp = _round_up(S, 16)           # sublane alignment (covers bf16 packing)
    Hk = _round_up(H, 128)          # lane alignment of the stage-1 contraction dim
    Hh = H // 2 + 1                 # Hermitian symmetry: only k3 in [0, H//2]

    max_tn, vmem_limit, n_cores = _tpu_budget()
    TN = min(max_tn, _round_up(Hh, 128))
    n_tiles = pl.cdiv(Hh, TN)
    # Keep the parallel (column-tile) axis balanced across TensorCores when it
    # would otherwise collapse to a single tile (v7x has 2 TCs per chip).
    if n_cores >= 2 and n_tiles == 1 and Hh > 128:
        TN = min(TN, _round_up(pl.cdiv(Hh, 2), 128))
        n_tiles = pl.cdiv(Hh, TN)
    Nh = n_tiles * TN               # zero-embedded padded output column count

    ch, shn, cs, ss, cb, sb = _dft_constants(B, S, H, Sp, Hk, Nh, Hh)
    ch_d = jnp.asarray(ch, dtype=weight_dtype)
    shn_d = jnp.asarray(shn, dtype=weight_dtype)
    cs_d = jnp.asarray(cs, dtype=weight_dtype)
    ss_d = jnp.asarray(ss, dtype=weight_dtype)
    cb_d = jnp.asarray(cb, dtype=jnp.float32)    # (B, B) -> SMEM
    sb_d = jnp.asarray(sb, dtype=jnp.float32)    # (B, B) -> SMEM

    # Zero-pad; the DFT matrices are zero-embedded to match, so padding never
    # changes the math and is sliced off below.
    xp = jnp.pad(x, ((0, 0), (0, Sp - S), (0, Hk - H)))
    xp = xp.astype(weight_dtype).reshape(B * Sp, Hk)

    itemsize = np.dtype(weight_dtype).itemsize
    flops = n_tiles * B * (4 * Sp * Hk * TN       # stage 1 (2 matmuls)
                           + 8 * Sp * Sp * TN     # stage 2 (4 matmuls)
                           + 4 * B * Sp * TN)     # stage 3 (VPU MACs)
    bytes_accessed = (n_tiles * B * Sp * Hk * itemsize   # x re-read per column tile
                      + 2 * Hk * Nh * itemsize           # cos_H / -sin_H
                      + 2 * Sp * Sp * itemsize           # cos_S / sin_S
                      + B * Sp * Nh * 4)                 # f32 output write

    kernel = _make_kernel(B, Sp, weight_dtype)

    out = pl.pallas_call(
        kernel,
        out_shape=jax.ShapeDtypeStruct((B * Sp, Nh), jnp.float32),
        grid_spec=pltpu.PrefetchScalarGridSpec(
            num_scalar_prefetch=0,
            grid=(n_tiles, B),                  # (parallel cols, batch reduction)
            in_specs=[
                # x: one (Sp, Hk) batch row per step — per-step VMEM residency
                # is independent of the batch size.
                pl.BlockSpec((Sp, Hk), lambda j, b: (b, 0)),
                # hidden-axis DFT column tiles: constant across b, so they are
                # fetched once per column tile and stay hot for the b loop.
                pl.BlockSpec((Hk, TN), lambda j, b: (0, j)),
                pl.BlockSpec((Hk, TN), lambda j, b: (0, j)),
                # seq-axis DFT matrices: constant index map -> fully resident.
                pl.BlockSpec((Sp, Sp), lambda j, b: (0, 0)),
                pl.BlockSpec((Sp, Sp), lambda j, b: (0, 0)),
                # (B, B) batch-DFT coefficients: tiny, read as scalars in-kernel.
                pl.BlockSpec(memory_space=pltpu.MemorySpace.SMEM),
                pl.BlockSpec(memory_space=pltpu.MemorySpace.SMEM),
            ],
            # Output block revisited across the innermost ("arbitrary") batch
            # axis: it is the stage-3 accumulator, initialized at b == 0.
            out_specs=pl.BlockSpec((B * Sp, TN), lambda j, b: (0, j)),
        ),
        compiler_params=pltpu.CompilerParams(
            dimension_semantics=("parallel", "arbitrary"),
            vmem_limit_bytes=int(vmem_limit),
        ),
        cost_estimate=pl.CostEstimate(flops=int(flops), transcendentals=0,
                                      bytes_accessed=int(bytes_accessed)),
    )(xp, ch_d, shn_d, cs_d, ss_d, cb_d, sb_d)

    # Low half of the spectrum (k3 <= H//2), computed by the kernel.
    y_low = out.reshape(B, Sp, Nh)[:, :S, :Hh]
    if Hh >= H:
        return y_low
    # Hermitian symmetry of the DFT of a real input:
    #   Re X[k1, k2, k3] = Re X[(-k1) % B, (-k2) % S, H - k3]   for k3 > H//2.
    kb = (-jnp.arange(B)) % B
    ks = (-jnp.arange(S)) % S
    kh = H - jnp.arange(Hh, H)               # values in [1, H-Hh] ⊂ computed cols
    y_high = y_low[kb][:, ks][:, :, kh]
    return jnp.concatenate([y_low, y_high], axis=-1)


if __name__ == "__main__":
    key0, key1 = jax.random.split(jax.random.PRNGKey(0))

    # FNet activations: (batch, seq, hidden).
    B, S, H = 2, 8, 32
    x = jax.random.normal(key0, (B, S, H), dtype=jnp.float32)
    y_ref = np.fft.fftn(np.asarray(x)).real

    # Exact-math path (f32 operands): tight tolerance.
    y32 = jax.block_until_ready(
        fourier_transform_layer(x, weight_dtype=jnp.float32))
    assert y32.shape == (B, S, H) and y32.dtype == jnp.float32
    assert np.allclose(np.asarray(y32), y_ref, rtol=2e-4, atol=2e-3), \
        "f32 Pallas real(fftn) mismatch vs numpy reference"

    # Default production path: bf16 MXU operands, f32 accumulation.
    ybf = jax.block_until_ready(fourier_transform_layer(x))
    assert ybf.shape == (B, S, H) and ybf.dtype == jnp.float32
    assert np.allclose(np.asarray(ybf), y_ref, rtol=5e-2, atol=5e-1), \
        "bf16 Pallas real(fftn) mismatch vs numpy reference"

    # Odd batch / seq / non-tile-aligned hidden: exercises the Hermitian
    # mirror, nonzero batch-DFT sine coefficients, and all padding paths.
    B2, S2, H2 = 3, 7, 40
    x2 = jax.random.normal(key1, (B2, S2, H2), dtype=jnp.float32)
    y2 = jax.block_until_ready(
        fourier_transform_layer(x2, weight_dtype=jnp.float32))
    y2_ref = np.fft.fftn(np.asarray(x2)).real
    assert y2.shape == (B2, S2, H2)
    assert np.allclose(np.asarray(y2), y2_ref, rtol=2e-4, atol=2e-3), \
        "f32 Pallas real(fftn) mismatch vs numpy reference (odd shapes)"

    print("KERNEL_OK")
</pallas_src>

<mosaic_0001>
module attributes {stable_mosaic.version = 11 : i64} {
  func.func @kernel(%arg0: i32, %arg1: i32, %arg2: memref<16x128xf32, #tpu.memory_space<vmem>>, %arg3: memref<128x128xf32, #tpu.memory_space<vmem>>, %arg4: memref<128x128xf32, #tpu.memory_space<vmem>>, %arg5: memref<16x16xf32, #tpu.memory_space<vmem>>, %arg6: memref<16x16xf32, #tpu.memory_space<vmem>>, %arg7: memref<2x2xf32, #tpu.memory_space<smem>>, %arg8: memref<2x2xf32, #tpu.memory_space<smem>>, %arg9: memref<32x128xf32, #tpu.memory_space<vmem>>) attributes {dimension_semantics = [#tpu.dimension_semantics<parallel>, #tpu.dimension_semantics<arbitrary>], iteration_bounds = array<i64: 1, 2>, scalar_prefetch = 0 : i64, scratch_operands = 0 : i64, tpu.core_type = #tpu.core_type<tc>, window_params = [{transform_indices = @transform_0, window_bounds = array<i64: 16, 128>}, {transform_indices = @transform_1, window_bounds = array<i64: 128, 128>}, {transform_indices = @transform_2, window_bounds = array<i64: 128, 128>}, {pipeline_mode = #tpu.pipeline_mode<synchronous>, transform_indices = @transform_3, window_bounds = array<i64: 16, 16>}, {pipeline_mode = #tpu.pipeline_mode<synchronous>, transform_indices = @transform_4, window_bounds = array<i64: 16, 16>}, {transform_indices = @transform_5, window_bounds = array<i64: 2, 2>}, {transform_indices = @transform_6, window_bounds = array<i64: 2, 2>}, {transform_indices = @transform_7, window_bounds = array<i64: 32, 128>}]} {
    %c0_i32 = arith.constant 0 : i32
    %0 = arith.cmpi eq, %arg1, %c0_i32 : i32
    %1 = arith.extui %0 : i1 to i32
    %c0_i32_0 = arith.constant 0 : i32
    %2 = arith.cmpi ne, %1, %c0_i32_0 : i32
    scf.if %2 {
      %cst_25 = arith.constant 0.000000e+00 : f32
      %40 = vector.broadcast %cst_25 : f32 to vector<32x128xf32>
      %c0_26 = arith.constant 0 : index
      %c0_27 = arith.constant 0 : index
      %41 = vector.load %arg9[%c0_26, %c0_27] : memref<32x128xf32, #tpu.memory_space<vmem>>, vector<32x128xf32>
      tpu.vector_store %arg9[%c0_26, %c0_27], %40 {strides = array<i32>} : memref<32x128xf32, #tpu.memory_space<vmem>>, vector<32x128xf32>,
    } else {
    }
    %c0 = arith.constant 0 : index
    %c0_1 = arith.constant 0 : index
    %3 = vector.load %arg2[%c0, %c0_1] : memref<16x128xf32, #tpu.memory_space<vmem>>, vector<16x128xf32>
    %c0_2 = arith.constant 0 : index
    %c0_3 = arith.constant 0 : index
    %4 = vector.load %arg3[%c0_2, %c0_3] : memref<128x128xf32, #tpu.memory_space<vmem>>, vector<128x128xf32>
    %cst = arith.constant dense<0.000000e+00> : vector<16x128xf32>
    %5 = tpu.matmul %3, %4, %cst {dimension_numbers = #tpu.dot_dimension_numbers<[1], [0], [0], [1], [0, 0, 1, 1], [], []>} : vector<16x128xf32>, vector<128x128xf32>, vector<16x128xf32> -> vector<16x128xf32>
    %c0_4 = arith.constant 0 : index
    %c0_5 = arith.constant 0 : index
    %6 = vector.load %arg4[%c0_4, %c0_5] : memref<128x128xf32, #tpu.memory_space<vmem>>, vector<128x128xf32>
    %cst_6 = arith.constant dense<0.000000e+00> : vector<16x128xf32>
    %7 = tpu.matmul %3, %6, %cst_6 {dimension_numbers = #tpu.dot_dimension_numbers<[1], [0], [0], [1], [0, 0, 1, 1], [], []>} : vector<16x128xf32>, vector<128x128xf32>, vector<16x128xf32> -> vector<16x128xf32>
    %c0_7 = arith.constant 0 : index
    %c0_8 = arith.constant 0 : index
    %8 = vector.load %arg5[%c0_7, %c0_8] : memref<16x16xf32, #tpu.memory_space<vmem>>, vector<16x16xf32>
    %c0_9 = arith.constant 0 : index
    %c0_10 = arith.constant 0 : index
    %9 = vector.load %arg6[%c0_9, %c0_10] : memref<16x16xf32, #tpu.memory_space<vmem>>, vector<16x16xf32>
    %cst_11 = arith.constant dense<0.000000e+00> : vector<16x128xf32>
    %10 = tpu.matmul %8, %5, %cst_11 {dimension_numbers = #tpu.dot_dimension_numbers<[1], [0], [0], [1], [0, 0, 1, 1], [], []>} : vector<16x16xf32>, vector<16x128xf32>, vector<16x128xf32> -> vector<16x128xf32>
    %cst_12 = arith.constant dense<0.000000e+00> : vector<16x128xf32>
    %11 = tpu.matmul %9, %7, %cst_12 {dimension_numbers = #tpu.dot_dimension_numbers<[1], [0], [0], [1], [0, 0, 1, 1], [], []>} : vector<16x16xf32>, vector<16x128xf32>, vector<16x128xf32> -> vector<16x128xf32>
    %12 = arith.addf %10, %11 : vector<16x128xf32>
    %cst_13 = arith.constant dense<0.000000e+00> : vector<16x128xf32>
    %13 = tpu.matmul %8, %7, %cst_13 {dimension_numbers = #tpu.dot_dimension_numbers<[1], [0], [0], [1], [0, 0, 1, 1], [], []>} : vector<16x16xf32>, vector<16x128xf32>, vector<16x128xf32> -> vector<16x128xf32>
    %cst_14 = arith.constant dense<0.000000e+00> : vector<16x128xf32>
    %14 = tpu.matmul %9, %5, %cst_14 {dimension_numbers = #tpu.dot_dimension_numbers<[1], [0], [0], [1], [0, 0, 1, 1], [], []>} : vector<16x16xf32>, vector<16x128xf32>, vector<16x128xf32> -> vector<16x128xf32>
    %15 = arith.subf %13, %14 : vector<16x128xf32>
    %c0_15 = arith.constant 0 : index
    %16 = arith.index_cast %arg1 : i32 to index
    %17 = memref.load %arg7[%c0_15, %16] : memref<2x2xf32, #tpu.memory_space<smem>>
    %c0_16 = arith.constant 0 : index
    %18 = arith.index_cast %arg1 : i32 to index
    %19 = memref.load %arg8[%c0_16, %18] : memref<2x2xf32, #tpu.memory_space<smem>>
    %c0_17 = arith.constant 0 : index
    %c0_18 = arith.constant 0 : index
    %20 = vector.load %arg9[%c0_17, %c0_18] : memref<32x128xf32, #tpu.memory_space<vmem>>, vector<16x128xf32>
    %21 = vector.broadcast %17 : f32 to vector<16x128xf32>
    %22 = arith.mulf %21, %12 : vector<16x128xf32>
    %23 = vector.broadcast %19 : f32 to vector<16x128xf32>
    %24 = arith.mulf %23, %15 : vector<16x128xf32>
    %25 = arith.addf %22, %24 : vector<16x128xf32>
    %26 = arith.addf %20, %25 : vector<16x128xf32>
    %c0_19 = arith.constant 0 : index
    %c0_20 = arith.constant 0 : index
    %27 = vector.load %arg9[%c0_19, %c0_20] : memref<32x128xf32, #tpu.memory_space<vmem>>, vector<16x128xf32>
    tpu.vector_store %arg9[%c0_19, %c0_20], %26 {strides = array<i32>} : memref<32x128xf32, #tpu.memory_space<vmem>>, vector<16x128xf32>,
    %c1 = arith.constant 1 : index
    %28 = arith.index_cast %arg1 : i32 to index
    %29 = memref.load %arg7[%c1, %28] : memref<2x2xf32, #tpu.memory_space<smem>>
    %c1_21 = arith.constant 1 : index
    %30 = arith.index_cast %arg1 : i32 to index
    %31 = memref.load %arg8[%c1_21, %30] : memref<2x2xf32, #tpu.memory_space<smem>>
    %c16 = arith.constant 16 : index
    %c0_22 = arith.constant 0 : index
    %32 = vector.load %arg9[%c16, %c0_22] : memref<32x128xf32, #tpu.memory_space<vmem>>, vector<16x128xf32>
    %33 = vector.broadcast %29 : f32 to vector<16x128xf32>
    %34 = arith.mulf %33, %12 : vector<16x128xf32>
    %35 = vector.broadcast %31 : f32 to vector<16x128xf32>
    %36 = arith.mulf %35, %15 : vector<16x128xf32>
    %37 = arith.addf %34, %36 : vector<16x128xf32>
    %38 = arith.addf %32, %37 : vector<16x128xf32>
    %c16_23 = arith.constant 16 : index
    %c0_24 = arith.constant 0 : index
    %39 = vector.load %arg9[%c16_23, %c0_24] : memref<32x128xf32, #tpu.memory_space<vmem>>, vector<16x128xf32>
    tpu.vector_store %arg9[%c16_23, %c0_24], %38 {strides = array<i32>} : memref<32x128xf32, #tpu.memory_space<vmem>>, vector<16x128xf32>,
    return
  }
  func.func @transform_0(%arg0: i32, %arg1: i32) -> (i32, i32) {
    %c0_i32 = arith.constant 0 : i32
    %c0_i32_0 = arith.constant 0 : i32
    return %arg1, %c0_i32 : i32, i32
  }
  func.func @transform_1(%arg0: i32, %arg1: i32) -> (i32, i32) {
    %c0_i32 = arith.constant 0 : i32
    %c0_i32_0 = arith.constant 0 : i32
    return %c0_i32, %arg0 : i32, i32
  }
  func.func @transform_2(%arg0: i32, %arg1: i32) -> (i32, i32) {
    %c0_i32 = arith.constant 0 : i32
    %c0_i32_0 = arith.constant 0 : i32
    return %c0_i32, %arg0 : i32, i32
  }
  func.func @transform_3(%arg0: i32, %arg1: i32) -> (i32, i32) {
    %c0_i32 = arith.constant 0 : i32
    %c0_i32_0 = arith.constant 0 : i32
    %c0_i32_1 = arith.constant 0 : i32
    return %c0_i32, %c0_i32_0 : i32, i32
  }
  func.func @transform_4(%arg0: i32, %arg1: i32) -> (i32, i32) {
    %c0_i32 = arith.constant 0 : i32
    %c0_i32_0 = arith.constant 0 : i32
    %c0_i32_1 = arith.constant 0 : i32
    return %c0_i32, %c0_i32_0 : i32, i32
  }
  func.func @transform_5(%arg0: i32, %arg1: i32) -> (i32, i32) {
    %c0_i32 = arith.constant 0 : i32
    %c0_i32_0 = arith.constant 0 : i32
    %c0_i32_1 = arith.constant 0 : i32
    return %c0_i32, %c0_i32_0 : i32, i32
  }
  func.func @transform_6(%arg0: i32, %arg1: i32) -> (i32, i32) {
    %c0_i32 = arith.constant 0 : i32
    %c0_i32_0 = arith.constant 0 : i32
    %c0_i32_1 = arith.constant 0 : i32
    return %c0_i32, %c0_i32_0 : i32, i32
  }
  func.func @transform_7(%arg0: i32, %arg1: i32) -> (i32, i32) {
    %c0_i32 = arith.constant 0 : i32
    %c0_i32_0 = arith.constant 0 : i32
    return %c0_i32, %arg0 : i32, i32
  }
}

</mosaic_0001>

<bundles_post_ra>
// kernel: tpu_custom_call.1
= control target key start
LH: loop header
LB: loop body
LE: loop exit
PB: predicated region body
PF: predicated region fallthrough
CT: control target
= control target key end

     0   :  { %s1479_s0 = inlined_call_operand.hbm [shape: f32[32,128], index: 0, kind: input, shape index: {}]   ;;  %s1480_s1 = inlined_call_operand.hbm [shape: f32[128,128], index: 1, kind: input, shape index: {}]   ;;  %s1481_s2 = inlined_call_operand.hbm [shape: f32[128,128], index: 2, kind: input, shape index: {}]   ;;  %s1482_s3 = inlined_call_operand.hbm [shape: f32[16,16], index: 3, kind: input, shape index: {}]   ;;  %s1483_s4 = inlined_call_operand.hbm [shape: f32[16,16], index: 4, kind: input, shape index: {}]   ;;  %s1484_s5 = inlined_call_operand.vmem [shape: f32[2,2], index: 5, kind: input, shape index: {}]   ;;  %s1485_s6 = inlined_call_operand.vmem [shape: f32[2,2], index: 6, kind: input, shape index: {}]   ;;  %s1486_s7 = inlined_call_operand.hbm [shape: f32[32,128], index: 7, kind: output, shape index: {}]  }
   0x1   :  { %1490 = sst [smem:[#allocation22_spill]] %s1480_s1 }
   0x2   :  { %1491 = sst [smem:[#allocation23_spill]] %s1481_s2 }
   0x3   :  { %12 = vsyncpa [#allocation3], 0 }
   0x4   :  { %14 = vsyncpa [#allocation3 + $0x1], 0 }
   0x5   :  { %15 = vsyncpa [#allocation7], 0 }
   0x6   :  { %16 = vsyncpa [#allocation10], 0 }
   0x7   :  { %17 = vsyncpa [#allocation5], 0 }
   0x8   :  { %18 = vsyncpa [#allocation14], 0 }
   0x9   :  { %19 = vsyncpa [#allocation4], 0  ;;  %s1285_s24 = smov 0   ;;  %s1287_s25 = smov 0  }
   0xa   :  { %s1289_s26 = smov 0   ;;  %s1291_s27 = smov 0  }
   0xb   :  { %s1293_s28 = smov 0   ;;  %s1295_s29 = smov 0  }
   0xc LB: > { %s1487_s30 = sadd.s32 4294967295, %s1231_s29   ;;  %p789_p0 = scmp.ge.s32.totalorder %s1231_s29, 1  ;;  %s1231_s29 = sphi %s1295_s29, %s25_s29   ;;  %s1227_s28 = sphi %s1293_s28, %s1506_s28   ;;  %s1223_s27 = sphi %s1291_s27, %s1505_s27   ;;  %s1219_s26 = sphi %s1289_s26, %s1504_s26   ;;  %s1215_s25 = sphi %s1287_s25, %s1503_s25   ;;  %s1211_s24 = sphi %s1285_s24, %s1502_s24  }
   0xd   : > { %p1319_p1 = scmp.eq.s32.totalorder %s1487_s30, 0  ;;  %p230_p2 = scmp.lt.s32.totalorder %s1231_s29, 3 }
   0xe   : > { %s1493_s1 = sld [smem:[#allocation22_spill]]  ;;  %s1233_s13 = smov [#allocation6]  }
   0xf   : > { %p1327_p3 = pnand %p789_p0, %p230_p2  ;;  %s245_s14 = sshll.u32 %s1233_s13, 4  ;;  %s246_s14 = int_to_ptr.vmem [resolvable:$true] %s245_s14 }
  0x10   : > { %s273_s18 = sshll.u32 %s1482_s3, 4  ;;  %s1488_s19 = smov 128   ;;  %s274_s18 = int_to_ptr.hbm [resolvable:$true] %s273_s18 }
  0x11   : > { %p855_p4 = pneg %p1327_p3  ;;  %s1489_s20 = smov 8  }
  0x12   : > { %s1236_s21 = smov [#allocation9]   ;;  %s1496_s2 = sld [smem:[#allocation23_spill]] }
  0x13   : > { %p1335_p5 = pnand %p855_p4, %p1319_p1  ;;  %s275_s22 = sshll.u32 %s1236_s21, 4  ;;  %s276_s22 = int_to_ptr.vmem [resolvable:$true] %s275_s22 }
  0x14   : > { %s243_s11 = sshll.u32 %s1493_s1, 4  ;;  %s287_s17 = sshll.u32 %s1483_s4, 4  ;;  %s244_s11 = int_to_ptr.hbm [resolvable:$true] %s243_s11  ;;  %s288_s17 = int_to_ptr.hbm [resolvable:$true] %s287_s17 }
  0x15   : > { %858 = dma.hbm_to_vmem [thread:$0]  (!%p1335_p5), %s244_s11, 2048, %s246_s14, [#allocation7], %s1488_s19, %s1488_s19, %s1489_s20  }
  0x16   : > { %864 = dma.hbm_to_vmem [thread:$0]  (!%p1335_p5), %s274_s18, 256, %s276_s22, [#allocation10], %s1488_s19, %s1488_s19, %s1489_s20  }
  0x17   : > { %s1237_s11 = smov [#allocation8]   ;;  %s1238_s21 = smov [#allocation11]  }
  0x18   : > { %s259_s10 = sshll.u32 %s1496_s2, 4  ;;  %s261_s14 = sshll.u32 %s1237_s11, 4  ;;  %s260_s10 = int_to_ptr.hbm [resolvable:$true] %s259_s10  ;;  %s262_s14 = int_to_ptr.vmem [resolvable:$true] %s261_s14 }
  0x19   : > { %861 = dma.hbm_to_vmem [thread:$0]  (!%p1335_p5), %s260_s10, 2048, %s262_s14, [#allocation7], %s1488_s19, %s1488_s19, %s1489_s20  }
  0x1a   : > { %s289_s18 = sshll.u32 %s1238_s21, 4  ;;  %s302_s9 = sshll.u32 %s1484_s5, 4  ;;  %s290_s18 = int_to_ptr.vmem [resolvable:$true] %s289_s18  ;;  %s303_s9 = int_to_ptr.vmem [resolvable:$true] %s302_s9 }
  0x1b   : > { %867 = dma.hbm_to_vmem [thread:$0]  (!%p1335_p5), %s288_s17, 256, %s290_s18, [#allocation10], %s1488_s19, %s1488_s19, %s1489_s20  }
  0x1c   : > { %s312_s16 = sshll.u32 %s1485_s6, 4  ;;  %s1239_s11 = smov [#allocation12]   ;;  %s313_s16 = int_to_ptr.vmem [resolvable:$true] %s312_s16 }
  0x1d   : > { %870 = dma.vmem_to_smem (!%p1335_p5), %s303_s9, 32, %s1239_s11, [#allocation5]  }
  0x1e   : > { %s1240_s14 = smov [#allocation13]   ;;  %s34_s21 = sadd.s32 1, %s1227_s28 }
  0x1f   : > { %873 = dma.vmem_to_smem (!%p1335_p5), %s313_s16, 32, %s1240_s14, [#allocation14]  }
  0x20   : > { %s44_s22 = sadd.s32 1, %s1219_s26  ;;  %p35_p6 = scmp.ge.s32.totalorder %s34_s21, 2 }
  0x21   : > { %p51_p7 = scmp.ne.s32.totalorder %s1219_s26, %s1215_s25  ;;  %p52_p8 = scmp.eq.s32.totalorder %s1231_s29, 0 }
  0x22   : > { %p57_p9 = scmp.ne.s32.totalorder %s1215_s25, %s1211_s24  ;;  %s1508_s21 = smov (%p35_p6, %s34_s21), 0 }
  0x23   : > { %p1387_p10 = por %p52_p8, %p51_p7  ;;  %s41_s18 = ssub.s32 %s1227_s28, %s1508_s21 }
  0x24   : > { %p1393_p11 = por %p1319_p1, %p57_p9  ;;  %p884_p12 = scmp.lt.s32.totalorder %s1231_s29, 2 }
  0x25   : > { %p42_p13 = scmp.eq.s32.totalorder %s41_s18, 0  ;;  %s323_s23 = sand.u32 1, %s1219_s26  }
  0x26   : > { %s797_s9 = sshll.u32 %s323_s23, 4  ;;  %s822_s24 = sshll.u32 %s1227_s28, 4 }
  0x27   : > { %s1402_s10 = scalar_select %p42_p13, %s1219_s26, %s44_s22  }
  0x28   : > { %s332_s11 = scalar_lea.hbm %s1479_s0, %s822_s24  ;;  %s327_s14 = scalar_lea.vmem [#allocation2], %s797_s9 }
  0x29   : > { %s335_s30 = sshll.u32 %s327_s14, 4  ;;  %s333_s19 = sshll.u32 %s332_s11, 4  ;;  %s336_s30 = int_to_ptr.vmem [resolvable:$true] %s335_s30  ;;  %s334_s19 = int_to_ptr.hbm [resolvable:$true] %s333_s19 }
  0x2a   : > { %p875_p0 = pnand %p884_p12, %p1387_p10  ;;  %s324_s20 = scalar_lea.sflag [#allocation3], %s323_s23 }
  0x2b   : > { %s1499_s1 = smov 8   ;;  %s1500_s2 = smov 128  }
  0x2c   : > { %877 = dma.hbm_to_vmem [thread:$0]  (!%p875_p0), %s334_s19, 256, %s336_s30, %s324_s20, %s1500_s2, %s1500_s2, %s1499_s1  }
  0x2d   : > { %347 = sbr.rel (%p1327_p3) target bundleno = 412 (0x19c), region = 48  ;;  %s349_s22 = sand.u32 (!%p1327_p3), 1, %s1215_s25  }
  0x2e   : > { %s1416_s18 = sshll.u32 (!%p1327_p3), %s349_s22, 4  ;;  %s350_s9 = scalar_lea.sflag (!%p1327_p3), [#allocation3], %s349_s22 }
  0x2f   : > { %s353_s24 = scalar_lea.vmem (!%p1327_p3), [#allocation2], %s1416_s18 }
  0x32   : > { %1186 = dma.done.wait (%p1393_p11), %s350_s9, 256  }
  0x33   : > { %1188 = vsyncadd (%p1393_p11), %s350_s9, 4294967040 }
  0x34   : > { %1190 = dma.done.wait (%p1319_p1), [#allocation7], 4096  }
  0x35   : > { %1192 = vsyncadd (%p1319_p1), [#allocation7], 4294963200 }
  0x36   : > { %1194 = dma.done.wait (%p1319_p1), [#allocation10], 512  }
  0x37   : > { %1196 = vsyncadd (%p1319_p1), [#allocation10], 4294966784 }
  0x38   : > { %1198 = dma.done.wait (%p1319_p1), [#allocation5], 32  }
  0x39   : > { %1200 = vsyncadd (%p1319_p1), [#allocation5], 4294967264 }
  0x3a   : > { %1202 = dma.done.wait (%p1319_p1), [#allocation14], 32  }
  0x3b   : > { %1204 = vsyncadd (%p1319_p1), [#allocation14], 4294967264 }
  0x3c   : > { %389 = sfence }
  0x3d   : > { %p808_p2 = scmp.ne.s32.totalorder %s1223_s27, 0 }
  0x3f   : > { %415 = sbr.rel (%p808_p2) target bundleno = 73 (0x49), region = 80 }
  0x44   : > { %v1241_v0 = vmov 0.0  }
  0x45   : > { %416 = vst [vmem:[#allocation15] sm:$0xff] %v1241_v0 }
  0x46   : > { %417 = vst [vmem:[#allocation15 + $0x8] sm:$0xff] %v1241_v0 }
  0x47   : > { %418 = vst [vmem:[#allocation15 + $0x10] sm:$0xff] %v1241_v0 }
  0x48   : > { %419 = vst [vmem:[#allocation15 + $0x18] sm:$0xff] %v1241_v0 }
  0x49 PF: > { %v437_v1 = vld [vmem:[#allocation6 + $0x78] sm:$0xff]  ;;  %v436_v3 = vld [vmem:[#allocation6 + $0x70] sm:$0xff]  ;;  %v435_v5 = vld [vmem:[#allocation6 + $0x68] sm:$0xff]  ;;  %vm504_vm0 = vcmask 130048   ;;  %s627_s1 = sshra.s32 %s1223_s27, 7  ;;  %s632_s8 = sand.u32 127, %s1223_s27 }
  0x4a   : > { %v476_v2 = vld [vmem:[#allocation8 + $0x78] sm:$0xff]  ;;  %438 = vmatpush.msra.mxu0 %v437_v1  ;;  %v475_v4 = vld [vmem:[#allocation8 + $0x70] sm:$0xff]  ;;  %v474_v6 = vld [vmem:[#allocation8 + $0x68] sm:$0xff]  ;;  %s823_s2 = sshll.u32 %s627_s1, 7  ;;  %s611_s19 = sld [smem:[#allocation12 + %s1223_s27]] }
  0x4b   : > { %477 = vmatpush.msra.mxu1 %v476_v2  ;;  %v434_v7 = vld [vmem:[#allocation6 + $0x60] sm:$0xff]  ;;  %v433_v9 = vld [vmem:[#allocation6 + $0x58] sm:$0xff]  ;;  %v432_v11 = vld [vmem:[#allocation6 + $0x50] sm:$0xff]  ;;  %s824_s30 = sadd.s32 128, %s823_s2  ;;  %s612_s17 = sld [smem:[#allocation13 + %s1223_s27]] }
  0x4c   : > { %439 = vmatpush.msra.mxu0 %v436_v3  ;;  %v473_v8 = vld [vmem:[#allocation8 + $0x60] sm:$0xff]  ;;  %v472_v10 = vld [vmem:[#allocation8 + $0x58] sm:$0xff]  ;;  %v471_v12 = vld [vmem:[#allocation8 + $0x50] sm:$0xff]  ;;  %s633_s12 = sadd.s32 %s824_s30, %s632_s8  ;;  %s1242_s27 = smov [#allocation15]  }
  0x4d   : > { %478 = vmatpush.msra.mxu1 %v475_v4  ;;  %v431_v13 = vld [vmem:[#allocation6 + $0x48] sm:$0xff]  ;;  %v430_v15 = vld [vmem:[#allocation6 + $0x40] sm:$0xff]  ;;  %v429_v17 = vld [vmem:[#allocation6 + $0x38] sm:$0xff]  ;;  %s634_s20 = sld [smem:[#allocation12 + %s633_s12]]  ;;  %s657_s23 = sshll.u32 %s1242_s27, 4  ;;  %s658_s23 = int_to_ptr.vmem [resolvable:$true] %s657_s23 }
  0x4e   : > { %440 = vmatpush.msra.mxu0 %v435_v5  ;;  %v470_v14 = vld [vmem:[#allocation8 + $0x48] sm:$0xff]  ;;  %v469_v16 = vld [vmem:[#allocation8 + $0x40] sm:$0xff]  ;;  %v468_v18 = vld [vmem:[#allocation8 + $0x38] sm:$0xff]  ;;  %s635_s15 = sld [smem:[#allocation13 + %s633_s12]]  ;;  %s659_s11 = sshll.u32 %s1486_s7, 4  ;;  %s660_s11 = int_to_ptr.hbm [resolvable:$true] %s659_s11 }
  0x4f   : > { %479 = vmatpush.msra.mxu1 %v474_v6  ;;  %v428_v19 = vld [vmem:[#allocation6 + $0x30] sm:$0xff]  ;;  %v427_v21 = vld [vmem:[#allocation6 + $0x28] sm:$0xff]  ;;  %v426_v23 = vld [vmem:[#allocation6 + $0x20] sm:$0xff]  ;;  %s1501_s14 = sadd.s32 4294967295, %s1231_s29   ;;  %s1243_s22 = smov 128  }
  0x50   : > { %441 = vmatpush.msra.mxu0 %v434_v7  ;;  %v467_v20 = vld [vmem:[#allocation8 + $0x30] sm:$0xff]  ;;  %v466_v22 = vld [vmem:[#allocation8 + $0x28] sm:$0xff]  ;;  %v465_v24 = vld [vmem:[#allocation8 + $0x20] sm:$0xff]  ;;  %v615_v48 = vstv %s611_s19  ;;  %p891_p1 = scmp.eq.s32.totalorder %s1501_s14, 1  ;;  %s1244_s18 = smov 8  }
  0x51   : > { %480 = vmatpush.msra.mxu1 %v473_v8  ;;  %v425_v25 = vld [vmem:[#allocation6 + $0x18] sm:$0xff]  ;;  %v424_v27 = vld [vmem:[#allocation6 + $0x10] sm:$0xff]  ;;  %v423_v29 = vld [vmem:[#allocation6 + $0x8] sm:$0xff]  ;;  %v618_v52 = vstv %s612_s17 }
  0x52   : > { %442 = vmatpush.msra.mxu0 %v433_v9  ;;  %v464_v26 = vld [vmem:[#allocation8 + $0x18] sm:$0xff]  ;;  %v463_v28 = vld [vmem:[#allocation8 + $0x10] sm:$0xff]  ;;  %v462_v30 = vld [vmem:[#allocation8 + $0x8] sm:$0xff] }
  0x53   : > { %481 = vmatpush.msra.mxu1 %v472_v10  ;;  %v422_v31 = vld [vmem:[#allocation6] sm:$0xff]  ;;  %v421_v34 = vld [vmem:[%s353_s24 + $0x8] sm:$0xff]  ;;  %v502_v39 = vld [vmem:[#allocation11] sm:$0xff]  ;;  %v638_v49 = vstv %s634_s20 }
  0x54   : > { %443 = vmatpush.msra.mxu0 %v432_v11  ;;  %v461_v32 = vld [vmem:[#allocation8] sm:$0xff]  ;;  %v503_v41 = vld [vmem:[#allocation11 + $0x8] sm:$0xff]  ;;  %v501_v42 = vld [vmem:[#allocation9 + $0x8] sm:$0xff]  ;;  %v641_v53 = vstv %s635_s15 }
  0x55   : > { %482 = vmatpush.msra.mxu1 %v471_v12  ;;  %v420_v33 = vld [vmem:[%s353_s24] sm:$0xff]  ;;  %v614_v9 = vld [vmem:[#allocation15 + $0x8] sm:$0xff]  ;;  %v637_v10 = vld [vmem:[#allocation15 + $0x18] sm:$0xff] }
  0x56   : > { %444 = vmatpush.msra.mxu0 %v431_v13  ;;  %v500_v40 = vld [vmem:[#allocation9] sm:$0xff]  ;;  %v636_v60 = vld [vmem:[#allocation15 + $0x10] sm:$0xff] }
  0x57   : > { %483 = vmatpush.msra.mxu1 %v470_v14  ;;  %v613_v59 = vld [vmem:[#allocation15] sm:$0xff] }
  0x58   : > { %445 = vmatpush.msra.mxu0 %v430_v15 }
  0x59   : > { %484 = vmatpush.msra.mxu1 %v469_v16 }
  0x5a   : > { %446 = vmatpush.msra.mxu0 %v429_v17 }
  0x5b   : > { %485 = vmatpush.msra.mxu1 %v468_v18 }
  0x5c   : > { %447 = vmatpush.msra.mxu0 %v428_v19 }
  0x5d   : > { %486 = vmatpush.msra.mxu1 %v467_v20 }
  0x5e   : > { %448 = vmatpush.msra.mxu0 %v427_v21 }
  0x5f   : > { %487 = vmatpush.msra.mxu1 %v466_v22 }
  0x60   : > { %449 = vmatpush.msra.mxu0 %v426_v23 }
  0x61   : > { %488 = vmatpush.msra.mxu1 %v465_v24 }
  0x62   : > { %450 = vmatpush.msra.mxu0 %v425_v25 }
  0x63   : > { %489 = vmatpush.msra.mxu1 %v464_v26 }
  0x64   : > { %451 = vmatpush.msra.mxu0 %v424_v27 }
  0x65   : > { %490 = vmatpush.msra.mxu1 %v463_v28 }
  0x66   : > { %452 = vmatpush.msra.mxu0 %v423_v29 }
  0x67   : > { %491 = vmatpush.msra.mxu1 %v462_v30 }
  0x68   : > { %453 = vmatpush.msra.mxu0 %v422_v31 }
  0x69   : > { %492 = vmatpush.msra.mxu1 %v461_v32  ;;  %454 = vmatmul.f32.vlgmr.msra.gmra.mxu0 %v420_v33 }
  0x6a   : > { %493 = vmatmul.f32.vlgmr.msra.gmra.mxu1 %v420_v33 }
  0x71   : > { %457 = vmatmul.f32.gmra.mxu0 %v421_v34 }
  0x72   : > { %496 = vmatmul.f32.gmra.mxu1 %v421_v34 }
  0xe6   : > { %v455_v35 = vpop.f32.mrf.mxu0 }
  0xe7   : > { %v494_v36 = vpop.f32.mrf.mxu1 }
  0xee   : > { %v458_v37 = vpop.f32.mrf.mxu0 }
  0xef   : > { %v497_v38 = vpop.f32.mrf.mxu1  ;;  %554 = vmatpush.msra.mxu3 %v458_v37 }
  0xf0   : > { %525 = vmatpush.msra.mxu2 %v497_v38 }
  0xf1   : > { %555 = vmatpush.msra.mxu3 %v455_v35 }
  0xf2   : > { %526 = vmatpush.msra.mxu2 %v494_v36  ;;  %811 = vmatmul.msk.f32.vlgmr.msra.gmra.mxu3 %vm504_vm0, %v500_v40 }
  0xf3   : > { %809 = vmatmul.msk.f32.vlgmr.msra.gmra.mxu2 %vm504_vm0, %v502_v39  ;;  %600 = vmatpush.msrb.mxu3 %v458_v37 }
  0xf4   : > { %577 = vmatpush.msrb.mxu2 %v497_v38 }
  0xf5   : > { %601 = vmatpush.msrb.mxu3 %v455_v35 }
  0xf6   : > { %578 = vmatpush.msrb.mxu2 %v494_v36 }
  0xfa   : > { %812 = vmatmul.msk.f32.gmra.mxu3 %vm504_vm0, %v501_v42 }
  0xfb   : > { %810 = vmatmul.msk.f32.gmra.mxu2 %vm504_vm0, %v503_v41 }
 0x102   : > { %815 = vmatmul.msk.f32.vlgmr.msrb.gmra.mxu3 %vm504_vm0, %v502_v39 }
 0x103   : > { %813 = vmatmul.msk.f32.vlgmr.msrb.gmra.mxu2 %vm504_vm0, %v500_v40 }
 0x10a   : > { %816 = vmatmul.msk.f32.gmra.mxu3 %vm504_vm0, %v503_v41 }
 0x10b   : > { %814 = vmatmul.msk.f32.gmra.mxu2 %vm504_vm0, %v501_v42 }
 0x175   : > { %v557_v44 = vpop.f32.mrf.mxu3 }
 0x176   : > { %v528_v43 = vpop.f32.mrf.mxu2 }
 0x177   : > { %v558_v47 = vadd.f32 %v557_v44, %v528_v43 }
 0x179   : > { %v616_v55 = vmul.f32 %v615_v48, %v558_v47  ;;  %v639_v56 = vmul.f32 %v638_v49, %v558_v47 }
 0x17d   : > { %v560_v46 = vpop.f32.mrf.mxu3 }
 0x17e   : > { %v531_v45 = vpop.f32.mrf.mxu2 }
 0x17f   : > { %v561_v63 = vadd.f32 %v560_v46, %v531_v45 }
 0x181   : > { %v617_v5 = vmul.f32 %v615_v48, %v561_v63  ;;  %v640_v6 = vmul.f32 %v638_v49, %v561_v63 }
 0x185   : > { %v603_v51 = vpop.f32.mrf.mxu3 }
 0x186   : > { %v580_v50 = vpop.f32.mrf.mxu2 }
 0x187   : > { %v609_v54 = vsub.f32 %v580_v50, %v603_v51 }
 0x189   : > { %v619_v57 = vmul.f32 %v618_v52, %v609_v54  ;;  %v642_v58 = vmul.f32 %v641_v53, %v609_v54 }
 0x18b   : > { %v621_v61 = vadd.f32 %v619_v57, %v616_v55  ;;  %v644_v62 = vadd.f32 %v642_v58, %v639_v56 }
 0x18d   : > { %v623_v0 = vadd.f32 %v621_v61, %v613_v59  ;;  %v646_v1 = vadd.f32 %v644_v62, %v636_v60  ;;  %v606_v3 = vpop.f32.mrf.mxu3 }
 0x18e   : > { %v583_v2 = vpop.f32.mrf.mxu2 }
 0x18f   : > { %625 = vst [vmem:[#allocation15] sm:$0xff] %v623_v0  ;;  %v610_v4 = vsub.f32 %v583_v2, %v606_v3 }
 0x190   : > { %648 = vst [vmem:[#allocation15 + $0x10] sm:$0xff] %v646_v1 }
 0x191   : > { %v620_v7 = vmul.f32 %v618_v52, %v610_v4  ;;  %v643_v8 = vmul.f32 %v641_v53, %v610_v4 }
 0x193   : > { %v622_v11 = vadd.f32 %v620_v7, %v617_v5  ;;  %v645_v12 = vadd.f32 %v643_v8, %v640_v6 }
 0x195   : > { %v624_v13 = vadd.f32 %v622_v11, %v614_v9  ;;  %v647_v14 = vadd.f32 %v645_v12, %v637_v10 }
 0x197   : > { %626 = vst [vmem:[#allocation15 + $0x8] sm:$0xff] %v624_v13 }
 0x198   : > { %649 = vst [vmem:[#allocation15 + $0x18] sm:$0xff] %v647_v14 }
 0x199   : > { %852 = dma.vmem_to_hbm [thread:$0]  (%p891_p1), %s658_s23, 512, %s660_s11, [#allocation4], %s1243_s22, %s1243_s22, %s1244_s18  }
 0x19a   : > { %1206 = dma.done.wait (%p891_p1), [#allocation4], 512  }
 0x19b   : > { %1208 = vsyncadd (%p891_p1), [#allocation4], 4294966784 }
 0x19c PF: > { %s25_s29 = sadd.s32 1, %s1231_s29   ;;  %s1502_s24 = smov %s1215_s25 }
 0x19d   : > { %p22_p3 = scmp.ge.s32.totalorder %s25_s29, 4   ;;  %s1503_s25 = smov %s1219_s26 }
 0x19e   : > { %s1504_s26 = smov %s1402_s10  ;;  %s1505_s27 = smov %s1227_s28 }
 0x19f   : > { %s1506_s28 = smov %s1508_s21  ;;  %24 = sbr.rel (!%p22_p3) target bundleno = 12 (0xc), region = 117 }
 0x1a4   :  { %676 = vsyncpa [#allocation3], 1 }
 0x1a5   :  { %678 = vsyncpa [#allocation3 + $0x1], 1 }
 0x1a6   :  { %679 = vsyncpa [#allocation7], 1 }
 0x1a7   :  { %680 = vsyncpa [#allocation10], 1 }
 0x1a8   :  { %681 = vsyncpa [#allocation4], 1 }
 0x1a9   :  { %683 = vsyncpa [#allocation4 + $0x1], 1 }
 0x1aa   :  { %684 = vsyncpa [#allocation5], 1 }
 0x1ab   :  { %686 = vsyncpa [#allocation5 + $0x1], 1 }
 0x1ac   :  { %687 = vsyncpa [#allocation14], 1 }

</bundles_post_ra>
